<compile_context>
chip_gen: v7x
topology: tpu7x:2x2x1
jax: 0.10.0
libtpu: 0.0.40
codegen_flags: <defaults>
</compile_context>

<pallas_src>
import functools

import jax
import jax.numpy as jnp
from jax.experimental import pallas as pl
from jax.experimental.pallas import tpu as pltpu


def _round_up(x, m):
    return ((x + m - 1) // m) * m


# ---------------------------------------------------------------------------
# Fused GIN layer kernel:  H_out = relu( ((1+eps) * H + A @ H) @ W + b )
# Grid: node tiles. A tile streams per step; H / W / b stay VMEM-resident.
# ---------------------------------------------------------------------------
def _gin_layer_kernel(a_ref, h_ref, w_ref, b_ref, o_ref, *, eps):
    tb = o_ref.shape[0]
    row0 = pl.multiple_of(pl.program_id(0) * tb, tb)

    h_all = h_ref[...]                                        # (Npad, Din) resident
    h_self = h_ref[pl.ds(row0, tb), :].astype(jnp.float32)    # (TB, Din)

    # Neighbor aggregation on the MXU: (TB, Npad) @ (Npad, Din), f32 accumulate.
    agg = jnp.dot(a_ref[...], h_all, preferred_element_type=jnp.float32)
    combined = (1.0 + eps) * h_self + agg                     # (TB, Din) f32

    # Linear + bias + ReLU.  Matmul inputs in the compute dtype (f32 or bf16),
    # accumulation and epilogue in f32; cast only at the store.
    z = jnp.dot(combined.astype(w_ref.dtype), w_ref[...],
                preferred_element_type=jnp.float32)
    z = z + b_ref[...]                                        # (1, Dout) broadcasts
    o_ref[...] = jnp.maximum(z, 0.0).astype(o_ref.dtype)


def gin_layer(a, h, w, b2d, *, eps, tb):
    npad, din = h.shape
    dout = w.shape[1]
    assert npad % tb == 0 and tb % 8 == 0

    itemsize = jnp.dtype(h.dtype).itemsize
    flops = 2 * npad * npad * din + 2 * npad * din * dout
    bytes_accessed = int(
        a.size * itemsize + h.size * itemsize + w.size * itemsize
        + b2d.size * 4 + npad * dout * itemsize)

    return pl.pallas_call(
        functools.partial(_gin_layer_kernel, eps=eps),
        out_shape=jax.ShapeDtypeStruct((npad, dout), h.dtype),
        grid=(npad // tb,),
        in_specs=[
            pl.BlockSpec((tb, npad), lambda i: (i, 0)),    # adjacency tile (streams)
            pl.BlockSpec((npad, din), lambda i: (0, 0)),   # full H, VMEM-resident
            pl.BlockSpec((din, dout), lambda i: (0, 0)),   # weight, VMEM-resident
            pl.BlockSpec((1, dout), lambda i: (0, 0)),     # bias
        ],
        out_specs=pl.BlockSpec((tb, dout), lambda i: (i, 0)),
        compiler_params=pltpu.CompilerParams(
            dimension_semantics=("parallel",)),
        cost_estimate=pl.CostEstimate(flops=flops, transcendentals=0,
                                      bytes_accessed=bytes_accessed),
    )(a, h, w, b2d)


# ---------------------------------------------------------------------------
# Readout kernel: weighted mean over nodes (dgl.mean_nodes equivalent).
# Accumulator pattern (P3): reduction axis tiled, init at step 0, store at last.
# Weights are pre-normalized (sum to 1), so this is a pure weighted sum.
# ---------------------------------------------------------------------------
def _readout_kernel(w_ref, h_ref, o_ref, acc_ref):
    @pl.when(pl.program_id(0) == 0)
    def _():
        acc_ref[...] = jnp.zeros_like(acc_ref)

    acc_ref[...] += jnp.sum(
        w_ref[...] * h_ref[...].astype(jnp.float32), axis=0, keepdims=True)

    @pl.when(pl.program_id(0) == pl.num_programs(0) - 1)
    def _():
        o_ref[...] = acc_ref[...].astype(o_ref.dtype)


def mean_readout(h, w_norm, *, tb):
    npad, d = h.shape
    return pl.pallas_call(
        _readout_kernel,
        out_shape=jax.ShapeDtypeStruct((1, d), jnp.float32),
        grid=(npad // tb,),
        in_specs=[
            pl.BlockSpec((tb, 1), lambda i: (i, 0)),       # normalized node weights
            pl.BlockSpec((tb, d), lambda i: (i, 0)),       # node features tile
        ],
        out_specs=pl.BlockSpec((1, d), lambda i: (0, 0)),  # lane-dense (d = 128)
        scratch_shapes=[pltpu.VMEM((1, d), jnp.float32)],
        compiler_params=pltpu.CompilerParams(
            dimension_semantics=("arbitrary",)),
    )(w_norm, h)


# ---------------------------------------------------------------------------
# RoadGNN forward.
# ---------------------------------------------------------------------------
def road_gnn_forward(adj, x, weights, biases, *, node_weight=None, readout=True,
                     eps=0.0, tb=None, use_bf16=False):
    """adj: (N, N) dense adjacency; x: (N, id_emb_dim); weights[l]: (in, out);
    biases[l]: (out,). Returns (1, hid_dim) graph embedding if readout else
    (N, hid_dim) node embeddings."""
    n, _ = x.shape
    if tb is None:
        tb = _round_up(min(n, 512), 8)       # largest useful node tile, sublane-aligned
    assert tb % 8 == 0
    npad = _round_up(n, tb)

    compute_dtype = jnp.bfloat16 if use_bf16 else jnp.float32
    a = jnp.pad(adj, ((0, npad - n), (0, npad - n))).astype(compute_dtype)
    h = jnp.pad(x, ((0, npad - n), (0, 0))).astype(compute_dtype)

    for w, b in zip(weights, biases):
        h = gin_layer(a, h,
                      w.astype(compute_dtype),
                      b.reshape(1, -1).astype(jnp.float32),
                      eps=eps, tb=tb)

    # TODO(synk): nn.Dropout is identity in eval mode (implemented as such);
    # training-mode dropout would use pltpu.prng_seed / stateful_bernoulli in-kernel.
    # TODO(synk): only the GIN branch (gnn_type != 'gat') is implemented; the
    # UnsupervisedGAT attention path and the DGL graph handle have no equivalent here.

    if not readout:
        return h[:n].astype(jnp.float32)

    if node_weight is None:
        wts = jnp.ones((n,), jnp.float32)
    else:
        wts = node_weight.astype(jnp.float32)
    w_norm = wts / jnp.sum(wts)                               # weighted mean == weighted sum
    w_norm = jnp.pad(w_norm, (0, npad - n)).reshape(npad, 1)  # padded nodes get weight 0
    return mean_readout(h, w_norm, tb=tb)


# ---------------------------------------------------------------------------
# Pure-JAX reference.
# ---------------------------------------------------------------------------
def _ref_forward(adj, x, weights, biases, node_weight=None, eps=0.0):
    h = x
    for w, b in zip(weights, biases):
        h = jnp.maximum(((1.0 + eps) * h + adj @ h) @ w + b, 0.0)
    if node_weight is None:
        pooled = jnp.mean(h, axis=0, keepdims=True)
    else:
        wn = node_weight / jnp.sum(node_weight)
        pooled = jnp.sum(wn[:, None] * h, axis=0, keepdims=True)
    return h, pooled


if __name__ == "__main__":
    # Small shapes consistent with the module; hid_dim=128 keeps stores lane-dense.
    num_nodes, id_emb_dim, hid_dim, num_layers = 256, 64, 128, 2
    tile_nodes = 128   # 2 node tiles -> exercises the "parallel" grid axis

    key = jax.random.PRNGKey(0)
    k_adj, k_x, k_w, k_nw = jax.random.split(key, 4)

    # Random sparse-ish graph as a dense 0/1 adjacency, no self-loops.
    adj = (jax.random.uniform(k_adj, (num_nodes, num_nodes)) < 0.05).astype(jnp.float32)
    adj = adj * (1.0 - jnp.eye(num_nodes, dtype=jnp.float32))

    x = jax.random.normal(k_x, (num_nodes, id_emb_dim), dtype=jnp.float32)

    # Layer parameters, created pre-transposed to (in, out) (no per-call weight.T).
    weights, biases = [], []
    din = id_emb_dim
    wkeys = jax.random.split(k_w, 2 * num_layers)
    for l in range(num_layers):
        bound = 1.0 / (din ** 0.5)
        weights.append(jax.random.uniform(wkeys[2 * l], (din, hid_dim),
                                          minval=-bound, maxval=bound,
                                          dtype=jnp.float32))
        biases.append(jax.random.uniform(wkeys[2 * l + 1], (hid_dim,),
                                         minval=-bound, maxval=bound,
                                         dtype=jnp.float32))
        din = hid_dim

    node_w = jax.random.uniform(k_nw, (num_nodes,), minval=0.1, maxval=1.0,
                                dtype=jnp.float32)

    # f32 path (matches the PyTorch module's semantics).
    node_feats = road_gnn_forward(adj, x, weights, biases,
                                  readout=False, tb=tile_nodes)
    pooled_unw = road_gnn_forward(adj, x, weights, biases,
                                  readout=True, tb=tile_nodes)
    pooled_w = road_gnn_forward(adj, x, weights, biases, node_weight=node_w,
                                readout=True, tb=tile_nodes)
    jax.block_until_ready((node_feats, pooled_unw, pooled_w))

    ref_nodes, ref_pool_unw = _ref_forward(adj, x, weights, biases)
    _, ref_pool_w = _ref_forward(adj, x, weights, biases, node_weight=node_w)

    assert node_feats.shape == (num_nodes, hid_dim)
    assert pooled_unw.shape == (1, hid_dim) and pooled_w.shape == (1, hid_dim)
    assert jnp.allclose(node_feats, ref_nodes, atol=1e-2, rtol=1e-2)
    assert jnp.allclose(pooled_unw, ref_pool_unw, atol=1e-2, rtol=1e-2)
    assert jnp.allclose(pooled_w, ref_pool_w, atol=1e-2, rtol=1e-2)

    # bf16-MXU / f32-accumulate path (v6e / v7x feedback): run + sanity check.
    pooled_bf16 = road_gnn_forward(adj, x, weights, biases, node_weight=node_w,
                                   readout=True, tb=tile_nodes, use_bf16=True)
    jax.block_until_ready(pooled_bf16)
    assert pooled_bf16.shape == (1, hid_dim)
    assert bool(jnp.all(jnp.isfinite(pooled_bf16)))
    assert jnp.max(jnp.abs(pooled_bf16 - ref_pool_w)) < 0.1 * (
        1.0 + jnp.max(jnp.abs(ref_pool_w)))

    print("KERNEL_OK")
</pallas_src>

<mosaic_0001>
module attributes {stable_mosaic.version = 11 : i64} {
  func.func @_gin_layer_kernel(%arg0: i32, %arg1: memref<128x256xf32, #tpu.memory_space<vmem>>, %arg2: memref<256x64xf32, #tpu.memory_space<vmem>>, %arg3: memref<64x128xf32, #tpu.memory_space<vmem>>, %arg4: memref<1x128xf32, #tpu.memory_space<vmem>>, %arg5: memref<128x128xf32, #tpu.memory_space<vmem>>) attributes {dimension_semantics = [#tpu.dimension_semantics<parallel>], iteration_bounds = array<i64: 2>, scalar_prefetch = 0 : i64, scratch_operands = 0 : i64, tpu.core_type = #tpu.core_type<tc>, window_params = [{transform_indices = @transform_0, window_bounds = array<i64: 128, 256>}, {pipeline_mode = #tpu.pipeline_mode<synchronous>, transform_indices = @transform_1, window_bounds = array<i64: 256, 64>}, {pipeline_mode = #tpu.pipeline_mode<synchronous>, transform_indices = @transform_2, window_bounds = array<i64: 64, 128>}, {pipeline_mode = #tpu.pipeline_mode<synchronous>, transform_indices = @transform_3, window_bounds = array<i64: 1, 128>}, {transform_indices = @transform_4, window_bounds = array<i64: 128, 128>}]} {
    %c128_i32 = arith.constant 128 : i32
    %0 = arith.muli %arg0, %c128_i32 : i32
    %1 = tpu.assume_multiple %0, 128 : i32
    %c0 = arith.constant 0 : index
    %c0_0 = arith.constant 0 : index
    %2 = vector.load %arg2[%c0, %c0_0] : memref<256x64xf32, #tpu.memory_space<vmem>>, vector<256x64xf32>
    %3 = arith.index_cast %1 : i32 to index
    %c0_1 = arith.constant 0 : index
    %4 = vector.load %arg2[%3, %c0_1] : memref<256x64xf32, #tpu.memory_space<vmem>>, vector<128x64xf32>
    %c0_2 = arith.constant 0 : index
    %c0_3 = arith.constant 0 : index
    %5 = vector.load %arg1[%c0_2, %c0_3] : memref<128x256xf32, #tpu.memory_space<vmem>>, vector<128x256xf32>
    %cst = arith.constant dense<0.000000e+00> : vector<128x64xf32>
    %6 = tpu.matmul %5, %2, %cst {dimension_numbers = #tpu.dot_dimension_numbers<[1], [0], [0], [1], [0, 0, 1, 1], [], []>} : vector<128x256xf32>, vector<256x64xf32>, vector<128x64xf32> -> vector<128x64xf32>
    %cst_4 = arith.constant 1.000000e+00 : f32
    %7 = vector.broadcast %cst_4 : f32 to vector<128x64xf32>
    %8 = arith.mulf %7, %4 : vector<128x64xf32>
    %9 = arith.addf %8, %6 : vector<128x64xf32>
    %c0_5 = arith.constant 0 : index
    %c0_6 = arith.constant 0 : index
    %10 = vector.load %arg3[%c0_5, %c0_6] : memref<64x128xf32, #tpu.memory_space<vmem>>, vector<64x128xf32>
    %cst_7 = arith.constant dense<0.000000e+00> : vector<128x128xf32>
    %11 = tpu.matmul %9, %10, %cst_7 {dimension_numbers = #tpu.dot_dimension_numbers<[1], [0], [0], [1], [0, 0, 1, 1], [], []>} : vector<128x64xf32>, vector<64x128xf32>, vector<128x128xf32> -> vector<128x128xf32>
    %c0_8 = arith.constant 0 : index
    %c0_9 = arith.constant 0 : index
    %12 = vector.load %arg4[%c0_8, %c0_9] : memref<1x128xf32, #tpu.memory_space<vmem>>, vector<1x128xf32>
    %13 = vector.broadcast %12 : vector<1x128xf32> to vector<128x128xf32>
    %14 = arith.addf %11, %13 : vector<128x128xf32>
    %cst_10 = arith.constant 0.000000e+00 : f32
    %15 = vector.broadcast %cst_10 : f32 to vector<128x128xf32>
    %16 = arith.maximumf %14, %15 : vector<128x128xf32>
    %c0_11 = arith.constant 0 : index
    %c0_12 = arith.constant 0 : index
    %17 = vector.load %arg5[%c0_11, %c0_12] : memref<128x128xf32, #tpu.memory_space<vmem>>, vector<128x128xf32>
    tpu.vector_store %arg5[%c0_11, %c0_12], %16 {strides = array<i32>} : memref<128x128xf32, #tpu.memory_space<vmem>>, vector<128x128xf32>,
    return
  }
  func.func @transform_0(%arg0: i32) -> (i32, i32) {
    %c0_i32 = arith.constant 0 : i32
    %c0_i32_0 = arith.constant 0 : i32
    return %arg0, %c0_i32 : i32, i32
  }
  func.func @transform_1(%arg0: i32) -> (i32, i32) {
    %c0_i32 = arith.constant 0 : i32
    %c0_i32_0 = arith.constant 0 : i32
    %c0_i32_1 = arith.constant 0 : i32
    return %c0_i32, %c0_i32_0 : i32, i32
  }
  func.func @transform_2(%arg0: i32) -> (i32, i32) {
    %c0_i32 = arith.constant 0 : i32
    %c0_i32_0 = arith.constant 0 : i32
    %c0_i32_1 = arith.constant 0 : i32
    return %c0_i32, %c0_i32_0 : i32, i32
  }
  func.func @transform_3(%arg0: i32) -> (i32, i32) {
    %c0_i32 = arith.constant 0 : i32
    %c0_i32_0 = arith.constant 0 : i32
    %c0_i32_1 = arith.constant 0 : i32
    return %c0_i32, %c0_i32_0 : i32, i32
  }
  func.func @transform_4(%arg0: i32) -> (i32, i32) {
    %c0_i32 = arith.constant 0 : i32
    %c0_i32_0 = arith.constant 0 : i32
    return %arg0, %c0_i32 : i32, i32
  }
}

</mosaic_0001>

<bundles_post_ra>
// kernel: tpu_custom_call.1
= control target key start
LH: loop header
LB: loop body
LE: loop exit
PB: predicated region body
PF: predicated region fallthrough
CT: control target
= control target key end

     0   :  { %9 = vsyncpa [#allocation3], 0  ;;  %s1619_s0 = inlined_call_operand.hbm [shape: f32[256,256], index: 0, kind: input, shape index: {}]   ;;  %s1620_s1 = inlined_call_operand.vmem [shape: f32[256,64], index: 1, kind: input, shape index: {}]   ;;  %s1621_s2 = inlined_call_operand.vmem [shape: f32[64,128], index: 2, kind: input, shape index: {}]   ;;  %s1622_s3 = inlined_call_operand.vmem [shape: f32[1,128], index: 3, kind: input, shape index: {}]   ;;  %s1623_s4 = inlined_call_operand.hbm [shape: f32[256,128], index: 4, kind: output, shape index: {}]  }
   0x1   :  { %11 = vsyncpa [#allocation3 + $0x1], 0 }
   0x2   :  { %12 = vsyncpa [#allocation4], 0 }
   0x3   :  { %14 = vsyncpa [#allocation4 + $0x1], 0  ;;  %s1215_s15 = smov 0   ;;  %s1217_s16 = smov 0  }
   0x4   :  { %s1219_s17 = smov 0   ;;  %s1221_s18 = smov 0  }
   0x5 LB: > { %s1236_s19 = sadd.s32 4294967295, %s1182_s18   ;;  %s792_s20 = sadd.s32 4294967294, %s1182_s18   ;;  %s1182_s18 = sphi %s1221_s18, %s1636_s18   ;;  %s1178_s17 = sphi %s1219_s17, %s1635_s17   ;;  %s1174_s16 = sphi %s1217_s16, %s1634_s16   ;;  %s1170_s15 = sphi %s1215_s15, %s1633_s15  }
   0x6   : > { %s1240_s21 = sadd.s32 1, %s1182_s18   ;;  %s27_s22 = sadd.s32 1, %s1178_s17 }
   0x7   : > { %s24_s23 = ssub.s32 %s1182_s18, %s1240_s21  ;;  %p34_p0 = scmp.ne.s32.totalorder %s1178_s17, %s1174_s16 }
   0x8   : > { %p25_p1 = scmp.eq.s32.totalorder %s24_s23, 0  ;;  %p35_p2 = scmp.eq.s32.totalorder %s1182_s18, 0 }
   0x9   : > { %p40_p3 = scmp.ne.s32.totalorder %s1174_s16, %s1170_s15  ;;  %p41_p4 = scmp.eq.s32.totalorder %s1236_s19, 0 }
   0xa   : > { %s1252_s24 = scalar_select %p25_p1, %s1178_s17, %s27_s22  }
   0xb   : > { %p1254_p5 = por %p35_p2, %p34_p0  ;;  %p1258_p6 = por %p41_p4, %p40_p3 }
   0xc   : > { %p127_p7 = scmp.eq.s32.totalorder %s1236_s19, 1  ;;  %p133_p8 = scmp.eq.s32.totalorder %s792_s20, 1 }
   0xd   : > { %p1048_p10 = scmp.lt.s32.totalorder %s1182_s18, 2  ;;  %s162_s29 = sand.u32 1, %s1178_s17  }
   0xe   : > { %p1265_p11 = por %p127_p7, %p34_p0  ;;  %p1269_p12 = por %p133_p8, %p40_p3 }
   0xf   : > { %s826_s30 = sshll.u32 %s1182_s18, 12  ;;  %s795_s5 = sshll.u32 %s162_s29, 8 }
  0x10   : > { %s1627_s27 = scalar_select %p1265_p11, 1, 0 }
  0x11   : > { %s1628_s28 = scalar_select %p1269_p12, 1, 0 }
  0x12   : > { %s1278_s8 = scalar_lea.hbm %s1619_s0, %s826_s30  ;;  %s166_s9 = scalar_lea.vmem [#allocation2], %s795_s5 }
  0x13   : > { %s174_s10 = sshll.u32 %s166_s9, 4  ;;  %p1282_p13 = pnand %p1048_p10, %p1254_p5  ;;  %s1286_s10 = int_to_ptr.vmem [resolvable:$true] %s174_s10 }
  0x14   : > { %s1288_s12 = scalar_lea.sflag [#allocation3], %s162_s29  ;;  %s1086_s13 = scalar_lea.hbm %s1278_s8, 4096 }
  0x15   : > { %p1087_p0 = scmp.ne.s32.totalorder %s1278_s8, %s1086_s13  ;;  %p1088_p1 = pneg %p1282_p13 }
  0x16   : > { %s1091_s22 = scalar_lea.hbm %s1619_s0, 8192  ;;  %p1092_p4 = scmp.lt.u32.totalorder %s1278_s8, %s1619_s0 }
  0x17   : > { %p1089_p2 = pnand %p1088_p1, %p1087_p0  ;;  %p1093_p5 = scmp.lt.u32.totalorder %s1091_s22, %s1086_s13 }
  0x18   : > { %p1095_p8 = scmp.lt.u32.totalorder %s1086_s13, %s1278_s8 }
  0x19   : > { %p1090_p3 = pneg %p1089_p2  ;;  %p1094_p7 = por %p1093_p5, %p1092_p4 }
  0x1b   : > { %p1096_p10 = por %p1095_p8, %p1094_p7 }
  0x1d   : > { %p1097_p9 = pnand %p1096_p10, %p1090_p3 }
  0x1f   : > { %1100 = shalt.err (!%p1097_p9)
}
  0x20   : > { %s1101_s29 = scalar_lea.vmem %s1286_s10, 4096  ;;  %s1184_s30 = smov [#allocation2]  }
  0x21   : > { %p1102_p0 = scmp.ne.s32.totalorder %s1286_s10, %s1101_s29  ;;  %s1106_s5 = sshll.u32 %s1184_s30, 4  ;;  %s1107_s5 = int_to_ptr.vmem [resolvable:$false] %s1106_s5 }
  0x22   : > { %s1108_s6 = scalar_lea.vmem %s1107_s5, 8192  ;;  %p1109_p11 = scmp.lt.s32.totalorder %s1286_s10, %s1107_s5 }
  0x23   : > { %p1104_p2 = pnand %p1102_p0, %p1088_p1  ;;  %p1110_p4 = scmp.lt.s32.totalorder %s1108_s6, %s1101_s29 }
  0x25   : > { %p1105_p12 = pneg %p1104_p2  ;;  %p1111_p5 = por %p1110_p4, %p1109_p11 }
  0x27   : > { %p1112_p7 = pnand %p1111_p5, %p1105_p12 }
  0x29   : > { %1115 = shalt.err (!%p1112_p7)
}
  0x2a   : > { %s1185_s7 = smov 256   ;;  %s1186_s9 = smov 16  }
  0x2b   : > { %1043 = dma.hbm_to_vmem [thread:$0]  (!%p1282_p13), %s1278_s8, 4096, %s1286_s10, %s1288_s12, %s1185_s7, %s1185_s7, %s1186_s9  }
  0x2c   : > { %p799_p9 = scmp.ge.s32.totalorder %s1182_s18, 1  ;;  %p182_p1 = scmp.lt.s32.totalorder %s1182_s18, 3 }
  0x2e   : > { %p183_p3 = pnand %p799_p9, %p182_p1 }
  0x2f   : > { %s1319_s13 = sand.u32 (!%p183_p3), 1, %s1174_s16  }
  0x30   : > { %186 = sbr.rel (%p183_p3) target bundleno = 592 (0x250), region = 36  ;;  %s800_s14 = sshll.u32 (!%p183_p3), %s1319_s13, 8 }
  0x31   : > { %s189_s20 = scalar_lea.sflag (!%p183_p3), [#allocation3], %s1319_s13  ;;  %s1323_s22 = scalar_lea.vmem (!%p183_p3), [#allocation2], %s800_s14 }
  0x37   : > { %1161 = dma.done.wait (%p1258_p6), %s189_s20, 4096  }
  0x38   : > { %1163 = vsyncadd (%p1258_p6), %s189_s20, 4294963200  ;;  %v236_v0 = vld [vmem:[%s1620_s1 + $0x80] sm:$0xff]  ;;  %v237_v1 = vld [vmem:[%s1620_s1 + $0x88] sm:$0xff]  ;;  %vm477_vm0 = vcmask 523264   ;;  %s801_s6 = sshll.u32 %s1319_s13, 7  ;;  %s827_s9 = sshll.u32 %s1236_s19, 11 }
  0x39   : > { %v220_v2 = vld [vmem:[%s1620_s1] sm:$0xff]  ;;  %v972_v3 = vpack.c.bf16 %v237_v1, %v236_v0  ;;  %v221_v4 = vld [vmem:[%s1620_s1 + $0x8] sm:$0xff]  ;;  %v238_v5 = vld [vmem:[%s1620_s1 + $0x90] sm:$0xff]  ;;  %s1536_s7 = scalar_lea.vmem [#allocation5], %s801_s6  ;;  %s1571_s10 = scalar_lea.hbm %s1623_s4, %s827_s9 }
  0x3a   : > { %v239_v6 = vld [vmem:[%s1620_s1 + $0x98] sm:$0xff]  ;;  %v974_v7 = vpack.c.bf16 %v221_v4, %v220_v2  ;;  %v222_v9 = vld [vmem:[%s1620_s1 + $0x10] sm:$0xff]  ;;  %v240_v11 = vld [vmem:[%s1620_s1 + $0xa0] sm:$0xff]  ;;  %s717_s14 = sshll.u32 %s1536_s7, 4  ;;  %p1630_p11 = scmp.ne.s32.totalorder %s1627_s27, 0  ;;  %s1573_s14 = int_to_ptr.vmem [resolvable:$true] %s717_s14 }
  0x3b   : > { %v976_v8 = vpack.c.bf16 %v239_v6, %v238_v5  ;;  %v223_v10 = vld [vmem:[%s1620_s1 + $0x18] sm:$0xff]  ;;  %973 = vmatprep.subr.bf16.mxu0 %v972_v3  ;;  %v241_v12 = vld [vmem:[%s1620_s1 + $0xa8] sm:$0xff]  ;;  %1020 = vmatprep.subr.bf16.mxu1 %v972_v3  ;;  %v224_v15 = vld [vmem:[%s1620_s1 + $0x20] sm:$0xff]  ;;  %s1116_s11 = scalar_lea.vmem %s1573_s14, 2048  ;;  %s1187_s12 = smov [#allocation5]  }
  0x3c   : > { %975 = vmatpush3.bf16.msra.mxu0 %v974_v7  ;;  %v978_v13 = vpack.c.bf16 %v223_v10, %v222_v9  ;;  %1028 = vmatpush3.bf16.msra.mxu1 %v974_v7  ;;  %v980_v14 = vpack.c.bf16 %v241_v12, %v240_v11  ;;  %v225_v16 = vld [vmem:[%s1620_s1 + $0x28] sm:$0xff]  ;;  %v242_v17 = vld [vmem:[%s1620_s1 + $0xb0] sm:$0xff]  ;;  %v243_v18 = vld [vmem:[%s1620_s1 + $0xb8] sm:$0xff]  ;;  %p1117_p6 = scmp.ne.s32.totalorder %s1573_s14, %s1116_s11  ;;  %s1120_s23 = sshll.u32 %s1187_s12, 4  ;;  %s1121_s23 = int_to_ptr.vmem [resolvable:$false] %s1120_s23 }
  0x3d   : > { %977 = vmatprep.subr.bf16.mxu0 %v976_v8  ;;  %1021 = vmatprep.subr.bf16.mxu1 %v976_v8  ;;  %v982_v19 = vpack.c.bf16 %v225_v16, %v224_v15  ;;  %v984_v20 = vpack.c.bf16 %v243_v18, %v242_v17  ;;  %v226_v21 = vld [vmem:[%s1620_s1 + $0x30] sm:$0xff]  ;;  %v227_v22 = vld [vmem:[%s1620_s1 + $0x38] sm:$0xff]  ;;  %v244_v23 = vld [vmem:[%s1620_s1 + $0xc0] sm:$0xff]  ;;  %p1123_p8 = scmp.lt.s32.totalorder %s1573_s14, %s1121_s23 }
  0x3e   : > { %v245_v24 = vld [vmem:[%s1620_s1 + $0xc8] sm:$0xff]  ;;  %v986_v26 = vpack.c.bf16 %v227_v22, %v226_v21  ;;  %v228_v28 = vld [vmem:[%s1620_s1 + $0x40] sm:$0xff]  ;;  %v246_v30 = vld [vmem:[%s1620_s1 + $0xd0] sm:$0xff]  ;;  %p1118_p12 = pnand %p1117_p6, %p1630_p11 }
  0x3f   : > { %v270_v25 = vld [vmem:[%s1323_s22 + $0x8] sm:$0xff]  ;;  %v988_v27 = vpack.c.bf16 %v245_v24, %v244_v23  ;;  %v247_v31 = vld [vmem:[%s1620_s1 + $0xd8] sm:$0xff]  ;;  %v230_v34 = vld [vmem:[%s1620_s1 + $0x50] sm:$0xff] }
  0x40   : > { %979 = vmatpush3.bf16.msra.mxu0 %v978_v13  ;;  %1029 = vmatpush3.bf16.msra.mxu1 %v978_v13  ;;  %v229_v29 = vld [vmem:[%s1620_s1 + $0x48] sm:$0xff]  ;;  %v992_v33 = vpack.c.bf16 %v247_v31, %v246_v30  ;;  %v231_v35 = vld [vmem:[%s1620_s1 + $0x58] sm:$0xff]  ;;  %v248_v37 = vld [vmem:[%s1620_s1 + $0xe0] sm:$0xff]  ;;  %p1119_p13 = pneg %p1118_p12 }
  0x41   : > { %981 = vmatprep.subr.bf16.mxu0 %v980_v14  ;;  %1022 = vmatprep.subr.bf16.mxu1 %v980_v14  ;;  %v990_v32 = vpack.c.bf16 %v229_v29, %v228_v28  ;;  %v294_v36 = vld [vmem:[%s1323_s22 + $0xc8] sm:$0xff]  ;;  %v994_v39 = vpack.c.bf16 %v231_v35, %v230_v34  ;;  %v232_v41 = vld [vmem:[%s1620_s1 + $0x60] sm:$0xff]  ;;  %v250_v43 = vld [vmem:[%s1620_s1 + $0xf0] sm:$0xff] }
  0x42   : > { %365 = vmatprep.mubr.f32.mxu0 %v270_v25  ;;  %v249_v38 = vld [vmem:[%s1620_s1 + $0xe8] sm:$0xff]  ;;  %425 = vmatprep.mubr.f32.mxu1 %v294_v36  ;;  %v251_v44 = vld [vmem:[%s1620_s1 + $0xf8] sm:$0xff]  ;;  %v234_v47 = vld [vmem:[%s1620_s1 + $0x70] sm:$0xff] }
  0x43   : > { %v996_v40 = vpack.c.bf16 %v249_v38, %v248_v37  ;;  %v233_v42 = vld [vmem:[%s1620_s1 + $0x68] sm:$0xff]  ;;  %v1000_v46 = vpack.c.bf16 %v251_v44, %v250_v43  ;;  %v235_v48 = vld [vmem:[%s1620_s1 + $0x78] sm:$0xff]  ;;  %v462_v49 = vld [vmem:[%s1621_s2] sm:$0xff] }
  0x44   : > { %983 = vmatpush3.bf16.msra.mxu0 %v982_v19  ;;  %1030 = vmatpush3.bf16.msra.mxu1 %v982_v19  ;;  %v998_v45 = vpack.c.bf16 %v233_v42, %v232_v41  ;;  %v463_v50 = vld [vmem:[%s1621_s2 + $0x8] sm:$0xff]  ;;  %v1002_v51 = vpack.c.bf16 %v235_v48, %v234_v47  ;;  %v464_v53 = vld [vmem:[%s1621_s2 + $0x10] sm:$0xff]  ;;  %v465_v54 = vld [vmem:[%s1621_s2 + $0x18] sm:$0xff] }
  0x45   : > { %985 = vmatprep.subr.bf16.mxu0 %v984_v20  ;;  %1023 = vmatprep.subr.bf16.mxu1 %v984_v20  ;;  %v1004_v52 = vpack.c.bf16 %v463_v50, %v462_v49  ;;  %v269_v55 = vld [vmem:[%s1323_s22] sm:$0xff]  ;;  %v272_v57 = vld [vmem:[%s1323_s22 + $0x18] sm:$0xff]  ;;  %v1008_v59 = vpack.c.bf16 %v465_v54, %v464_v53  ;;  %v271_v60 = vld [vmem:[%s1323_s22 + $0x10] sm:$0xff] }
  0x46   : > { %v293_v56 = vld [vmem:[%s1323_s22 + $0xc0] sm:$0xff]  ;;  %v296_v58 = vld [vmem:[%s1323_s22 + $0xd8] sm:$0xff]  ;;  %v295_v61 = vld [vmem:[%s1323_s22 + $0xd0] sm:$0xff] }
  0x47   : > { %v274_v62 = vld [vmem:[%s1323_s22 + $0x28] sm:$0xff]  ;;  %v273_v0 = vld [vmem:[%s1323_s22 + $0x20] sm:$0xff]  ;;  %v276_v2 = vld [vmem:[%s1323_s22 + $0x38] sm:$0xff] }
  0x48   : > { %987 = vmatpush3.bf16.msra.mxu0 %v986_v26  ;;  %1031 = vmatpush3.bf16.msra.mxu1 %v986_v26  ;;  %v298_v63 = vld [vmem:[%s1323_s22 + $0xe8] sm:$0xff]  ;;  %v297_v1 = vld [vmem:[%s1323_s22 + $0xe0] sm:$0xff]  ;;  %v300_v3 = vld [vmem:[%s1323_s22 + $0xf8] sm:$0xff] }
  0x49   : > { %989 = vmatprep.subr.bf16.mxu0 %v988_v27  ;;  %1024 = vmatprep.subr.bf16.mxu1 %v988_v27  ;;  %v275_v4 = vld [vmem:[%s1323_s22 + $0x30] sm:$0xff]  ;;  %v278_v6 = vld [vmem:[%s1323_s22 + $0x48] sm:$0xff]  ;;  %v277_v7 = vld [vmem:[%s1323_s22 + $0x40] sm:$0xff] }
  0x4a   : > { %v299_v5 = vld [vmem:[%s1323_s22 + $0xf0] sm:$0xff]  ;;  %v280_v8 = vld [vmem:[%s1323_s22 + $0x58] sm:$0xff]  ;;  %v282_v10 = vld [vmem:[%s1323_s22 + $0x68] sm:$0xff] }
  0x4b   : > { %v279_v9 = vld [vmem:[%s1323_s22 + $0x50] sm:$0xff]  ;;  %v281_v11 = vld [vmem:[%s1323_s22 + $0x60] sm:$0xff]  ;;  %v284_v12 = vld [vmem:[%s1323_s22 + $0x78] sm:$0xff] }
  0x4c   : > { %991 = vmatpush3.bf16.msra.mxu0 %v990_v32  ;;  %1032 = vmatpush3.bf16.msra.mxu1 %v990_v32  ;;  %v283_v13 = vld [vmem:[%s1323_s22 + $0x70] sm:$0xff]  ;;  %v286_v14 = vld [vmem:[%s1323_s22 + $0x88] sm:$0xff]  ;;  %v285_v15 = vld [vmem:[%s1323_s22 + $0x80] sm:$0xff] }
  0x4d   : > { %993 = vmatprep.subr.bf16.mxu0 %v992_v33  ;;  %1025 = vmatprep.subr.bf16.mxu1 %v992_v33  ;;  %v288_v16 = vld [vmem:[%s1323_s22 + $0x98] sm:$0xff]  ;;  %v287_v17 = vld [vmem:[%s1323_s22 + $0x90] sm:$0xff]  ;;  %v290_v18 = vld [vmem:[%s1323_s22 + $0xa8] sm:$0xff] }
  0x4e   : > { %v289_v19 = vld [vmem:[%s1323_s22 + $0xa0] sm:$0xff]  ;;  %v292_v20 = vld [vmem:[%s1323_s22 + $0xb8] sm:$0xff]  ;;  %v291_v21 = vld [vmem:[%s1323_s22 + $0xb0] sm:$0xff]  ;;  %s802_s22 = sshll.u32 %s1236_s19, 7  ;;  %s704_s19 = scalar_lea.sflag [#allocation4], %s1319_s13 }
  0x4f   : > { %v466_v22 = vld [vmem:[%s1621_s2 + $0x20] sm:$0xff]  ;;  %v467_v23 = vld [vmem:[%s1621_s2 + $0x28] sm:$0xff]  ;;  %v468_v25 = vld [vmem:[%s1621_s2 + $0x30] sm:$0xff]  ;;  %s1485_s30 = scalar_lea.vmem %s1620_s1, %s802_s22  ;;  %s1122_s22 = scalar_lea.vmem %s1121_s23, 4096 }
  0x50   : > { %995 = vmatpush3.bf16.msra.mxu0 %v994_v39  ;;  %1033 = vmatpush3.bf16.msra.mxu1 %v994_v39  ;;  %v1012_v24 = vpack.c.bf16 %v467_v23, %v466_v22  ;;  %v469_v26 = vld [vmem:[%s1621_s2 + $0x38] sm:$0xff]  ;;  %v253_v30 = vld [vmem:[%s1485_s30] sm:$0xff]  ;;  %v254_v38 = vld [vmem:[%s1485_s30 + $0x8] sm:$0xff]  ;;  %p1124_p10 = scmp.lt.s32.totalorder %s1122_s22, %s1116_s11 }
  0x51   : > { %997 = vmatprep.subr.bf16.mxu0 %v996_v40  ;;  %1026 = vmatprep.subr.bf16.mxu1 %v996_v40  ;;  %v1016_v27 = vpack.c.bf16 %v469_v26, %v468_v25  ;;  %v256_v54 = vld [vmem:[%s1485_s30 + $0x18] sm:$0xff]  ;;  %v262_v22 = vld [vmem:[%s1485_s30 + $0x48] sm:$0xff] }
  0x52   : > { %p1125_p0 = por %p1124_p10, %p1123_p8 }
  0x54   : > { %999 = vmatpush3.bf16.msra.mxu0 %v998_v45  ;;  %1034 = vmatpush3.bf16.msra.mxu1 %v998_v45  ;;  %p1126_p2 = pnand %p1125_p0, %p1119_p13 }
  0x55   : > { %1001 = vmatprep.subr.bf16.mxu0 %v1000_v46  ;;  %1027 = vmatprep.subr.bf16.mxu1 %v1000_v46  ;;  %v255_v46 = vld [vmem:[%s1485_s30 + $0x10] sm:$0xff] }
  0x58   : > { %1003 = vmatpush3.bf16.msra.mxu0 %v1002_v51  ;;  %1035 = vmatpush3.bf16.msra.mxu1 %v1002_v51 }
  0x59   : > { %1005 = vmatprep.subr.bf16.mxu1 %v1004_v52 }
  0x5b   : > { %366 = vmatmul.mubr.f32.vlgmr.msra.gmra.mrb[0].mxu0 %v269_v55  ;;  %426 = vmatmul.mubr.f32.vlgmr.msra.gmra.mrb[0].mxu1 %v293_v56 }
  0x5c   : > { %370 = vmatprep.mubr.f32.mxu0 %v272_v57  ;;  %430 = vmatprep.mubr.f32.mxu1 %v296_v58 }
  0x5d   : > { %1007 = vmatpush3.bf16.msra.mxu1 %v1004_v52 }
  0x5e   : > { %1009 = vmatprep.subr.bf16.mxu1 %v1008_v59 }
  0x5f   : > { %371 = vmatmul.mubr.f32.gmra.mrb[2].mxu0 %v271_v60  ;;  %431 = vmatmul.mubr.f32.gmra.mrb[2].mxu1 %v295_v61  ;;  %v257_v61 = vld [vmem:[%s1485_s30 + $0x20] sm:$0xff] }
  0x60   : > { %375 = vmatprep.mubr.f32.mxu0 %v274_v62  ;;  %435 = vmatprep.mubr.f32.mxu1 %v298_v63 }
  0x61   : > { %1011 = vmatpush3.bf16.msra.mxu1 %v1008_v59 }
  0x62   : > { %1013 = vmatprep.subr.bf16.mxu1 %v1012_v24 }
  0x63   : > { %376 = vmatmul.mubr.f32.gmra.mrb[4].mxu0 %v273_v0  ;;  %436 = vmatmul.mubr.f32.gmra.mrb[4].mxu1 %v297_v1 }
  0x64   : > { %380 = vmatprep.mubr.f32.mxu0 %v276_v2  ;;  %440 = vmatprep.mubr.f32.mxu1 %v300_v3  ;;  %v258_v2 = vld [vmem:[%s1485_s30 + $0x28] sm:$0xff] }
  0x65   : > { %1015 = vmatpush3.bf16.msra.mxu1 %v1012_v24 }
  0x66   : > { %1017 = vmatprep.subr.bf16.mxu1 %v1016_v27 }
  0x67   : > { %381 = vmatmul.mubr.f32.gmra.mrb[6].mxu0 %v275_v4  ;;  %441 = vmatmul.mubr.f32.gmra.mrb[6].mxu1 %v299_v5 }
  0x68   : > { %385 = vmatprep.mubr.f32.mxu0 %v278_v6 }
  0x69   : > { %1019 = vmatpush3.bf16.msra.mxu1 %v1016_v27  ;;  %v263_v27 = vld [vmem:[%s1485_s30 + $0x50] sm:$0xff] }
  0x6b   : > { %386 = vmatmul.mubr.f32.gmra.mrb[8].mxu0 %v277_v7  ;;  %v259_v7 = vld [vmem:[%s1485_s30 + $0x30] sm:$0xff] }
  0x6c   : > { %390 = vmatprep.mubr.f32.mxu0 %v280_v8 }
  0x6f   : > { %391 = vmatmul.mubr.f32.gmra.mrb[10].mxu0 %v279_v9 }
  0x70   : > { %395 = vmatprep.mubr.f32.mxu0 %v282_v10 }
  0x73   : > { %396 = vmatmul.mubr.f32.gmra.mrb[12].mxu0 %v281_v11 }
  0x74   : > { %400 = vmatprep.mubr.f32.mxu0 %v284_v12  ;;  %v260_v12 = vld [vmem:[%s1485_s30 + $0x38] sm:$0xff] }
  0x77   : > { %401 = vmatmul.mubr.f32.gmra.mrb[14].mxu0 %v283_v13 }
  0x78   : > { %405 = vmatprep.mubr.f32.mxu0 %v286_v14 }
  0x7b   : > { %406 = vmatmul.mubr.f32.gmra.mrb[16].mxu0 %v285_v15 }
  0x7c   : > { %410 = vmatprep.mubr.f32.mxu0 %v288_v16 }
  0x7f   : > { %411 = vmatmul.mubr.f32.gmra.mrb[18].mxu0 %v287_v17  ;;  %v261_v17 = vld [vmem:[%s1485_s30 + $0x40] sm:$0xff] }
  0x80   : > { %415 = vmatprep.mubr.f32.mxu0 %v290_v18 }
  0x83   : > { %416 = vmatmul.mubr.f32.gmra.mrb[20].mxu0 %v289_v19 }
  0x84   : > { %420 = vmatprep.mubr.f32.mxu0 %v292_v20 }
  0x87   : > { %421 = vmatmul.mubr.f32.gmra.mrb[22].mxu0 %v291_v21 }
 0x12e   : > { %v860_v28 = vpop.f32.mrb[0].mxu0  ;;  %v896_v29 = vpop.f32.mrb[0].mxu1 }
 0x12f   : > { %v861_v31 = vpop.f32.mrb[1].mxu0  ;;  %v897_v32 = vpop.f32.mrb[1].mxu1 }
 0x130   : > { %v862_v33 = vadd.f32 %v861_v31, %v860_v28  ;;  %v1488_v34 = vadd.f32 %v897_v32, %v896_v29  ;;  %v264_v32 = vld [vmem:[%s1485_s30 + $0x58] sm:$0xff] }
 0x132   : > { %v446_v35 = vadd.f32 %v862_v33, %v253_v30  ;;  %v863_v36 = vpop.f32.mrb[2].mxu0  ;;  %v899_v37 = vpop.f32.mrb[2].mxu1 }
 0x133   : > { %v864_v39 = vpop.f32.mrb[3].mxu0  ;;  %v900_v40 = vpop.f32.mrb[3].mxu1 }
 0x134   : > { %v865_v41 = vadd.f32 %v864_v39, %v863_v36  ;;  %948 = vmatprep.mubr.msk.f32.mxu1 %vm477_vm0, %v446_v35  ;;  %v1492_v42 = vadd.f32 %v900_v40, %v899_v37  ;;  %v265_v35 = vld [vmem:[%s1485_s30 + $0x60] sm:$0xff]  ;;  %v266_v39 = vld [vmem:[%s1485_s30 + $0x68] sm:$0xff]  ;;  %v267_v40 = vld [vmem:[%s1485_s30 + $0x70] sm:$0xff] }
 0x136   : > { %v447_v43 = vadd.f32 %v865_v41, %v254_v38  ;;  %v866_v44 = vpop.f32.mrb[4].mxu0  ;;  %v902_v45 = vpop.f32.mrb[4].mxu1  ;;  %v458_v38 = vadd.f32 %v1488_v34, %v265_v35  ;;  %v268_v41 = vld [vmem:[%s1485_s30 + $0x78] sm:$0xff]  ;;  %v1531_v34 = vld [vmem:[%s1622_s3] ss:$0 sm:$0xff] }
 0x137   : > { %v867_v47 = vpop.f32.mrb[5].mxu0  ;;  %v903_v48 = vpop.f32.mrb[5].mxu1 }
 0x138   : > { %v868_v49 = vadd.f32 %v867_v47, %v866_v44  ;;  %949 = vmatmul.mubr.msk.f32.vlgmr.msra.gmra.mrb[8].mxu1 %vm477_vm0, %v447_v43  ;;  %v1496_v50 = vadd.f32 %v903_v48, %v902_v45  ;;  %v459_v43 = vadd.f32 %v1492_v42, %v266_v39 }
 0x13a   : > { %v448_v51 = vadd.f32 %v868_v49, %v255_v46  ;;  %v869_v52 = vpop.f32.mrb[6].mxu0  ;;  %v905_v53 = vpop.f32.mrb[6].mxu1  ;;  %v460_v44 = vadd.f32 %v1496_v50, %v267_v40 }
 0x13b   : > { %v870_v55 = vpop.f32.mrb[7].mxu0  ;;  %v906_v56 = vpop.f32.mrb[7].mxu1 }
 0x13c   : > { %v871_v57 = vadd.f32 %v870_v55, %v869_v52  ;;  %951 = vmatprep.mubr.msk.f32.mxu1 %vm477_vm0, %v448_v51  ;;  %v907_v58 = vadd.f32 %v906_v56, %v905_v53 }
 0x13e   : > { %v449_v59 = vadd.f32 %v871_v57, %v256_v54  ;;  %v872_v60 = vpop.f32.mrb[8].mxu0  ;;  %v461_v45 = vadd.f32 %v907_v58, %v268_v41 }
 0x13f   : > { %v873_v62 = vpop.f32.mrb[9].mxu0 }
 0x140   : > { %v874_v63 = vadd.f32 %v873_v62, %v872_v60  ;;  %952 = vmatmul.mubr.msk.f32.gmra.mrb[10].mxu1 %vm477_vm0, %v449_v59 }
 0x142   : > { %v450_v0 = vadd.f32 %v874_v63, %v257_v61  ;;  %v875_v1 = vpop.f32.mrb[10].mxu0 }
 0x143   : > { %v876_v3 = vpop.f32.mrb[11].mxu0 }
 0x144   : > { %v877_v4 = vadd.f32 %v876_v3, %v875_v1  ;;  %954 = vmatprep.mubr.msk.f32.mxu1 %vm477_vm0, %v450_v0 }
 0x146   : > { %v451_v5 = vadd.f32 %v877_v4, %v258_v2  ;;  %v878_v6 = vpop.f32.mrb[12].mxu0 }
 0x147   : > { %v879_v8 = vpop.f32.mrb[13].mxu0 }
 0x148   : > { %v880_v9 = vadd.f32 %v879_v8, %v878_v6  ;;  %955 = vmatmul.mubr.msk.f32.gmra.mrb[12].mxu1 %vm477_vm0, %v451_v5 }
 0x14a   : > { %v452_v10 = vadd.f32 %v880_v9, %v259_v7  ;;  %v881_v11 = vpop.f32.mrb[14].mxu0 }
 0x14b   : > { %v882_v13 = vpop.f32.mrb[15].mxu0 }
 0x14c   : > { %v883_v14 = vadd.f32 %v882_v13, %v881_v11  ;;  %957 = vmatprep.mubr.msk.f32.mxu1 %vm477_vm0, %v452_v10 }
 0x14e   : > { %v453_v15 = vadd.f32 %v883_v14, %v260_v12  ;;  %v884_v16 = vpop.f32.mrb[16].mxu0 }
 0x14f   : > { %v885_v18 = vpop.f32.mrb[17].mxu0 }
 0x150   : > { %v886_v19 = vadd.f32 %v885_v18, %v884_v16  ;;  %958 = vmatmul.mubr.msk.f32.gmra.mrb[14].mxu1 %vm477_vm0, %v453_v15 }
 0x152   : > { %v454_v20 = vadd.f32 %v886_v19, %v261_v17  ;;  %v887_v21 = vpop.f32.mrb[18].mxu0 }
 0x153   : > { %v888_v23 = vpop.f32.mrb[19].mxu0 }
 0x154   : > { %v889_v24 = vadd.f32 %v888_v23, %v887_v21  ;;  %960 = vmatprep.mubr.msk.f32.mxu1 %vm477_vm0, %v454_v20 }
 0x156   : > { %v455_v25 = vadd.f32 %v889_v24, %v262_v22  ;;  %v890_v26 = vpop.f32.mrb[20].mxu0 }
 0x157   : > { %v891_v28 = vpop.f32.mrb[21].mxu0 }
 0x158   : > { %v892_v29 = vadd.f32 %v891_v28, %v890_v26  ;;  %961 = vmatmul.mubr.msk.f32.gmra.mrb[16].mxu1 %vm477_vm0, %v455_v25 }
 0x15a   : > { %v456_v30 = vadd.f32 %v892_v29, %v263_v27  ;;  %v893_v31 = vpop.f32.mrb[22].mxu0 }
 0x15b   : > { %v894_v33 = vpop.f32.mrb[23].mxu0 }
 0x15c   : > { %v895_v36 = vadd.f32 %v894_v33, %v893_v31  ;;  %963 = vmatprep.mubr.msk.f32.mxu1 %vm477_vm0, %v456_v30 }
 0x15e   : > { %v457_v37 = vadd.f32 %v895_v36, %v264_v32 }
 0x160   : > { %964 = vmatmul.mubr.msk.f32.gmra.mrb[18].mxu1 %vm477_vm0, %v457_v37 }
 0x161   : > { %966 = vmatprep.mubr.msk.f32.mxu1 %vm477_vm0, %v458_v38 }
 0x164   : > { %967 = vmatmul.mubr.msk.f32.gmra.mrb[20].mxu1 %vm477_vm0, %v459_v43 }
 0x165   : > { %969 = vmatprep.mubr.msk.f32.mxu1 %vm477_vm0, %v460_v44 }
 0x168   : > { %970 = vmatmul.mubr.msk.f32.gmra.mrb[22].mxu1 %vm477_vm0, %v461_v45 }
 0x20b   : > { %v950_v46 = vpop.f32.mrb[8].mxu1 }
 0x20c   : > { %v598_v47 = vadd.f32 %v950_v46, %v1531_v34  ;;  %v592_v48 = vpop.f32.mrb[9].mxu1 }
 0x20d   : > { %v593_v42 = vadd.f32 %v1531_v34, %v592_v48 }
 0x20e   : > { %v672_v49 = vmax.f32 %v598_v47, 0.0 }
 0x20f   : > { %v671_v50 = vmax.f32 %v593_v42, 0.0 }
 0x210   : > { %688 = vst [vmem:[%s1536_s7 + $0x8] sm:$0xff] %v672_v49 }
 0x211   : > { %687 = vst [vmem:[%s1536_s7] sm:$0xff] %v671_v50 }
 0x213   : > { %v953_v51 = vpop.f32.mrb[10].mxu1 }
 0x214   : > { %v608_v52 = vadd.f32 %v953_v51, %v1531_v34  ;;  %v602_v53 = vpop.f32.mrb[11].mxu1 }
 0x215   : > { %v603_v54 = vadd.f32 %v1531_v34, %v602_v53 }
 0x216   : > { %v674_v55 = vmax.f32 %v608_v52, 0.0 }
 0x217   : > { %v673_v56 = vmax.f32 %v603_v54, 0.0 }
 0x218   : > { %690 = vst [vmem:[%s1536_s7 + $0x18] sm:$0xff] %v674_v55 }
 0x219   : > { %689 = vst [vmem:[%s1536_s7 + $0x10] sm:$0xff] %v673_v56 }
 0x21b   : > { %v956_v57 = vpop.f32.mrb[12].mxu1 }
 0x21c   : > { %v618_v58 = vadd.f32 %v956_v57, %v1531_v34  ;;  %v612_v59 = vpop.f32.mrb[13].mxu1 }
 0x21d   : > { %v613_v60 = vadd.f32 %v1531_v34, %v612_v59 }
 0x21e   : > { %v676_v61 = vmax.f32 %v618_v58, 0.0 }
 0x21f   : > { %v675_v62 = vmax.f32 %v613_v60, 0.0 }
 0x220   : > { %692 = vst [vmem:[%s1536_s7 + $0x28] sm:$0xff] %v676_v61 }
 0x221   : > { %691 = vst [vmem:[%s1536_s7 + $0x20] sm:$0xff] %v675_v62 }
 0x223   : > { %v959_v63 = vpop.f32.mrb[14].mxu1 }
 0x224   : > { %v628_v0 = vadd.f32 %v959_v63, %v1531_v34  ;;  %v622_v1 = vpop.f32.mrb[15].mxu1 }
 0x225   : > { %v623_v2 = vadd.f32 %v1531_v34, %v622_v1 }
 0x226   : > { %v678_v3 = vmax.f32 %v628_v0, 0.0 }
 0x227   : > { %v677_v4 = vmax.f32 %v623_v2, 0.0 }
 0x228   : > { %694 = vst [vmem:[%s1536_s7 + $0x38] sm:$0xff] %v678_v3 }
 0x229   : > { %693 = vst [vmem:[%s1536_s7 + $0x30] sm:$0xff] %v677_v4 }
 0x22b   : > { %v962_v5 = vpop.f32.mrb[16].mxu1 }
 0x22c   : > { %v638_v6 = vadd.f32 %v962_v5, %v1531_v34  ;;  %v632_v7 = vpop.f32.mrb[17].mxu1 }
 0x22d   : > { %v633_v8 = vadd.f32 %v1531_v34, %v632_v7 }
 0x22e   : > { %v680_v9 = vmax.f32 %v638_v6, 0.0 }
 0x22f   : > { %v679_v10 = vmax.f32 %v633_v8, 0.0 }
 0x230   : > { %696 = vst [vmem:[%s1536_s7 + $0x48] sm:$0xff] %v680_v9 }
 0x231   : > { %695 = vst [vmem:[%s1536_s7 + $0x40] sm:$0xff] %v679_v10 }
 0x233   : > { %v965_v11 = vpop.f32.mrb[18].mxu1 }
 0x234   : > { %v648_v12 = vadd.f32 %v965_v11, %v1531_v34  ;;  %v642_v13 = vpop.f32.mrb[19].mxu1 }
 0x235   : > { %v643_v14 = vadd.f32 %v1531_v34, %v642_v13 }
 0x236   : > { %v682_v15 = vmax.f32 %v648_v12, 0.0 }
 0x237   : > { %v681_v16 = vmax.f32 %v643_v14, 0.0  ;;  %v968_v17 = vpop.f32.mrb[20].mxu1 }
 0x238   : > { %698 = vst [vmem:[%s1536_s7 + $0x58] sm:$0xff] %v682_v15  ;;  %v658_v18 = vadd.f32 %v968_v17, %v1531_v34  ;;  %v652_v19 = vpop.f32.mrb[21].mxu1 }
 0x239   : > { %697 = vst [vmem:[%s1536_s7 + $0x50] sm:$0xff] %v681_v16  ;;  %v653_v20 = vadd.f32 %v1531_v34, %v652_v19 }
 0x23a   : > { %v684_v21 = vmax.f32 %v658_v18, 0.0 }
 0x23b   : > { %v683_v22 = vmax.f32 %v653_v20, 0.0  ;;  %v971_v23 = vpop.f32.mrb[22].mxu1 }
 0x23c   : > { %700 = vst [vmem:[%s1536_s7 + $0x68] sm:$0xff] %v684_v21  ;;  %v668_v24 = vadd.f32 %v971_v23, %v1531_v34  ;;  %v662_v25 = vpop.f32.mrb[23].mxu1 }
 0x23d   : > { %699 = vst [vmem:[%s1536_s7 + $0x60] sm:$0xff] %v683_v22  ;;  %v663_v26 = vadd.f32 %v1531_v34, %v662_v25 }
 0x23e   : > { %v686_v27 = vmax.f32 %v668_v24, 0.0 }
 0x23f   : > { %v685_v28 = vmax.f32 %v663_v26, 0.0 }
 0x240   : > { %702 = vst [vmem:[%s1536_s7 + $0x78] sm:$0xff] %v686_v27 }
 0x241   : > { %701 = vst [vmem:[%s1536_s7 + $0x70] sm:$0xff] %v685_v28 }
 0x242   : > { %1129 = shalt.err (!%p1126_p2)
}
 0x243   : > { %s1130_s25 = scalar_lea.hbm %s1571_s10, 2048  ;;  %s1134_s5 = scalar_lea.hbm %s1623_s4, 4096 }
 0x244   : > { %p1131_p4 = scmp.ne.s32.totalorder %s1571_s10, %s1130_s25  ;;  %p1135_p9 = scmp.lt.u32.totalorder %s1571_s10, %s1623_s4 }
 0x245   : > { %p1136_p1 = scmp.lt.u32.totalorder %s1134_s5, %s1130_s25  ;;  %p1138_p6 = scmp.lt.u32.totalorder %s1130_s25, %s1571_s10 }
 0x246   : > { %p1132_p5 = pnand %p1131_p4, %p1630_p11 }
 0x247   : > { %p1137_p3 = por %p1136_p1, %p1135_p9 }
 0x248   : > { %p1133_p7 = pneg %p1132_p5 }
 0x249   : > { %p1139_p12 = por %p1138_p6, %p1137_p3 }
 0x24b   : > { %p1140_p13 = pnand %p1139_p12, %p1133_p7 }
 0x24d   : > { %1143 = shalt.err (!%p1140_p13)
}
 0x24e   : > { %s1188_s7 = smov 128   ;;  %s1189_s9 = smov 8  }
 0x24f   : > { %1038 = dma.vmem_to_hbm [thread:$0]  (%p1630_p11), %s1573_s14, 2048, %s1571_s10, %s704_s19, %s1188_s7, %s1188_s7, %s1189_s9  }
 0x250 PF: > { %s732_s20 = sand.u32 1, %s1170_s15   ;;  %p1631_p8 = scmp.ne.s32.totalorder %s1628_s28, 0 }
 0x251   : > { %p1632_p10 = scmp.ge.s32.totalorder %s1182_s18, 2  ;;  %s733_s8 = scalar_lea.sflag [#allocation4], %s732_s20 }
 0x253   : > { %p1045_p0 = pnand %p1632_p10, %p1631_p8 }
 0x255   : > { %1165 = dma.done.wait (!%p1045_p0), %s733_s8, 2048  }
 0x256   : > { %1167 = vsyncadd (!%p1045_p0), %s733_s8, 4294965248  ;;  %p17_p2 = scmp.ge.s32.totalorder %s1240_s21, 4   ;;  %s1633_s15 = smov %s1174_s16 }
 0x257   : > { %s1634_s16 = smov %s1178_s17  ;;  %s1635_s17 = smov %s1252_s24 }
 0x258   : > { %s1636_s18 = smov %s1240_s21  ;;  %19 = sbr.rel (!%p17_p2) target bundleno = 5 (0x5), region = 82 }
 0x25f   :  { %738 = vsyncpa [#allocation3], 1 }
 0x260   :  { %740 = vsyncpa [#allocation3 + $0x1], 1 }
 0x261   :  { %741 = vsyncpa [#allocation4], 1 }
 0x262   :  { %743 = vsyncpa [#allocation4 + $0x1], 1 }

</bundles_post_ra>
